<compile_context>
chip_gen: v6e
topology: v6e:2x2x1
jax: 0.10.0
libtpu: 0.0.40
codegen_flags: <defaults>
</compile_context>

<pallas_src>
import math
import jax
import jax.numpy as jnp
from jax.experimental import pallas as pl
from jax.experimental.pallas import tpu as pltpu


def _round_up(x, m):
    return (x + m - 1) // m * m


def _vmem_limit(est_bytes):
    # Explicit scoped-VMEM budget from tile sizes, with headroom; safe on all gens.
    return int(min(64 * 2**20, max(4 * est_bytes + 2 * 2**20, 16 * 2**20)))


def _pick_tiles(n):
    """Bigger tiles for big graphs (amortize per-step overhead), >=2 row tiles."""
    if n >= 4096:
        return 256, 512
    if n >= 1024:
        return 256, 256
    return 128, 128


# --------------------- projection: support = x @ W (once) ---------------------

def _project_kernel(x_ref, w_ref, s_ref):
    s_ref[...] = jnp.dot(
        x_ref[...], w_ref[...], preferred_element_type=jnp.float32
    ).astype(s_ref.dtype)


def _project(x, w, *, tile_rows):
    Nk, F_in = x.shape
    Fp = w.shape[1]
    itm = x.dtype.itemsize
    est = 2 * (tile_rows * F_in + F_in * Fp + tile_rows * Fp) * itm
    return pl.pallas_call(
        _project_kernel,
        out_shape=jax.ShapeDtypeStruct((Nk, Fp), x.dtype),
        grid_spec=pltpu.PrefetchScalarGridSpec(
            num_scalar_prefetch=0,
            grid=(Nk // tile_rows,),
            in_specs=[
                pl.BlockSpec((tile_rows, F_in), lambda i: (i, 0)),  # x row tile
                pl.BlockSpec((F_in, Fp), lambda i: (0, 0)),         # full W (small)
            ],
            out_specs=pl.BlockSpec((tile_rows, Fp), lambda i: (i, 0)),
        ),
        compiler_params=pltpu.CompilerParams(
            dimension_semantics=("parallel",),
            vmem_limit_bytes=_vmem_limit(est),
        ),
    )(x, w)


# --------------- aggregation: out = relu(adj @ support), K-tiled ---------------

def _aggregate_kernel(adj_ref, sup_ref, o_ref, acc_ref):
    k = pl.program_id(1)

    @pl.when(k == 0)
    def _():
        acc_ref[...] = jnp.zeros_like(acc_ref)

    acc_ref[...] += jnp.dot(
        adj_ref[...], sup_ref[...], preferred_element_type=jnp.float32
    )

    @pl.when(k == pl.num_programs(1) - 1)
    def _():
        o_ref[...] = jnp.maximum(acc_ref[...], 0.0).astype(o_ref.dtype)  # ReLU


def _aggregate(adj, support, *, tile_m, tile_k, out_dtype):
    Nm, Nk = adj.shape
    Fp = support.shape[1]
    est = (2 * tile_m * tile_k * adj.dtype.itemsize           # adj (double-buffered)
           + 2 * tile_k * Fp * support.dtype.itemsize         # support tiles
           + 2 * tile_m * Fp * jnp.dtype(out_dtype).itemsize  # output tile
           + tile_m * Fp * 4)                                  # f32 accumulator
    return pl.pallas_call(
        _aggregate_kernel,
        out_shape=jax.ShapeDtypeStruct((Nm, Fp), out_dtype),
        grid_spec=pltpu.PrefetchScalarGridSpec(
            num_scalar_prefetch=0,
            grid=(Nm // tile_m, Nk // tile_k),
            in_specs=[
                pl.BlockSpec((tile_m, tile_k), lambda i, k: (i, k)),  # adj tile
                pl.BlockSpec((tile_k, Fp), lambda i, k: (k, 0)),      # support tile
            ],
            out_specs=pl.BlockSpec((tile_m, Fp), lambda i, k: (i, 0)),
            scratch_shapes=[pltpu.VMEM((tile_m, Fp), jnp.float32)],
        ),
        compiler_params=pltpu.CompilerParams(
            dimension_semantics=("parallel", "arbitrary"),
            vmem_limit_bytes=_vmem_limit(est),
        ),
    )(adj, support)


# ------------------------------- public wrapper --------------------------------

def graph_convolution(x, adj, weight, *, tile_m=None, tile_k=None,
                      compute_dtype=None, out_dtype=None):
    """relu(adj @ (x @ weight)) — GCN forward (dropout p=0.0 is the identity)."""
    N, F_in = x.shape
    F_out = weight.shape[1]
    out_dtype = out_dtype or x.dtype
    cdt = jnp.dtype(compute_dtype) if compute_dtype is not None else x.dtype

    auto_m, auto_k = _pick_tiles(N)
    tile_m = tile_m or auto_m
    tile_k = tile_k or auto_k

    # Pad node count to the tile grid and F_out to a lane-dense multiple of 128.
    Nm = _round_up(N, tile_m)          # output / adj-row padding
    Nk = _round_up(N, tile_k)          # adj-column / support-row padding
    Fp = _round_up(F_out, 128)

    x_p = jnp.zeros((Nk, F_in), cdt).at[:N, :].set(x.astype(cdt))
    w_p = jnp.zeros((F_in, Fp), cdt).at[:, :F_out].set(weight.astype(cdt))
    adj_p = jnp.zeros((Nm, Nk), cdt).at[:N, :N].set(adj.astype(cdt))

    support = _project(x_p, w_p, tile_rows=tile_k)             # (Nk, Fp), computed once
    out_p = _aggregate(adj_p, support, tile_m=tile_m, tile_k=tile_k,
                       out_dtype=out_dtype)                    # (Nm, Fp)
    return out_p[:N, :F_out]


def xavier_uniform(key, fan_in, fan_out, dtype=jnp.float32):
    bound = math.sqrt(6.0 / (fan_in + fan_out))
    return jax.random.uniform(key, (fan_in, fan_out), dtype,
                              minval=-bound, maxval=bound)


if __name__ == "__main__":
    key = jax.random.PRNGKey(0)
    k_x, k_adj, k_w = jax.random.split(key, 3)

    N, F_in, F_out = 256, 32, 64   # small synthetic GCN layer (2 row tiles -> both TCs)
    x = jax.random.normal(k_x, (N, F_in), dtype=jnp.float32)

    # Random row-normalized sparse adjacency (densified, like adj.to_dense()).
    adj_raw = (jax.random.uniform(k_adj, (N, N)) < 0.1).astype(jnp.float32)
    adj_raw = adj_raw + jnp.eye(N, dtype=jnp.float32)
    deg = jnp.sum(adj_raw, axis=1, keepdims=True)
    adj = adj_raw / deg

    weight = xavier_uniform(k_w, F_in, F_out)  # matches reset_parameters()

    # Pure-JAX reference.
    ref = jnp.maximum(adj @ (x @ weight), 0.0)

    # f32 path — tight check.
    out = graph_convolution(x, adj, weight)
    out = jax.block_until_ready(out)
    assert out.shape == (N, F_out)
    assert jnp.allclose(out, ref, atol=1e-4, rtol=1e-4)

    # bf16 compute path (f32 accumulation in-kernel) — loose check.
    out_bf = graph_convolution(x, adj, weight,
                               compute_dtype=jnp.bfloat16, out_dtype=jnp.float32)
    out_bf = jax.block_until_ready(out_bf)
    assert jnp.allclose(out_bf, ref, atol=5e-2, rtol=5e-2)

    print("KERNEL_OK")
</pallas_src>

<mosaic_0001>
module attributes {stable_mosaic.version = 11 : i64} {
  func.func @_project_kernel(%arg0: i32, %arg1: memref<128x32xf32, #tpu.memory_space<vmem>>, %arg2: memref<32x128xf32, #tpu.memory_space<vmem>>, %arg3: memref<128x128xf32, #tpu.memory_space<vmem>>) attributes {dimension_semantics = [#tpu.dimension_semantics<parallel>], iteration_bounds = array<i64: 2>, scalar_prefetch = 0 : i64, scratch_operands = 0 : i64, tpu.core_type = #tpu.core_type<tc>, window_params = [{transform_indices = @transform_0, window_bounds = array<i64: 128, 32>}, {pipeline_mode = #tpu.pipeline_mode<synchronous>, transform_indices = @transform_1, window_bounds = array<i64: 32, 128>}, {transform_indices = @transform_2, window_bounds = array<i64: 128, 128>}]} {
    %c0 = arith.constant 0 : index
    %c0_0 = arith.constant 0 : index
    %0 = vector.load %arg1[%c0, %c0_0] : memref<128x32xf32, #tpu.memory_space<vmem>>, vector<128x32xf32>
    %c0_1 = arith.constant 0 : index
    %c0_2 = arith.constant 0 : index
    %1 = vector.load %arg2[%c0_1, %c0_2] : memref<32x128xf32, #tpu.memory_space<vmem>>, vector<32x128xf32>
    %cst = arith.constant dense<0.000000e+00> : vector<128x128xf32>
    %2 = tpu.matmul %0, %1, %cst {dimension_numbers = #tpu.dot_dimension_numbers<[1], [0], [0], [1], [0, 0, 1, 1], [], []>} : vector<128x32xf32>, vector<32x128xf32>, vector<128x128xf32> -> vector<128x128xf32>
    %c0_3 = arith.constant 0 : index
    %c0_4 = arith.constant 0 : index
    %3 = vector.load %arg3[%c0_3, %c0_4] : memref<128x128xf32, #tpu.memory_space<vmem>>, vector<128x128xf32>
    tpu.vector_store %arg3[%c0_3, %c0_4], %2 {strides = array<i32>} : memref<128x128xf32, #tpu.memory_space<vmem>>, vector<128x128xf32>,
    return
  }
  func.func @transform_0(%arg0: i32) -> (i32, i32) {
    %c0_i32 = arith.constant 0 : i32
    %c0_i32_0 = arith.constant 0 : i32
    return %arg0, %c0_i32 : i32, i32
  }
  func.func @transform_1(%arg0: i32) -> (i32, i32) {
    %c0_i32 = arith.constant 0 : i32
    %c0_i32_0 = arith.constant 0 : i32
    %c0_i32_1 = arith.constant 0 : i32
    return %c0_i32, %c0_i32_0 : i32, i32
  }
  func.func @transform_2(%arg0: i32) -> (i32, i32) {
    %c0_i32 = arith.constant 0 : i32
    %c0_i32_0 = arith.constant 0 : i32
    return %arg0, %c0_i32 : i32, i32
  }
}

</mosaic_0001>

<bundles_post_ra>
// kernel: tpu_custom_call.1
= control target key start
LH: loop header
LB: loop body
LE: loop exit
PB: predicated region body
PF: predicated region fallthrough
CT: control target
= control target key end

     0   :  { %7 = vsyncpa [#allocation3], 0  ;;  %s831_s0 = inlined_call_operand.vmem [shape: f32[256,32], index: 0, kind: input, shape index: {}]   ;;  %s832_s1 = inlined_call_operand.vmem [shape: f32[32,128], index: 1, kind: input, shape index: {}]   ;;  %s833_s2 = inlined_call_operand.hbm [shape: f32[256,128], index: 2, kind: output, shape index: {}]  }
   0x1   :  { %9 = vsyncpa [#allocation3 + $0x1], 0  ;;  %s661_s9 = smov 0   ;;  %s663_s10 = smov 0  }
   0x2   :  { %s665_s11 = smov 0   ;;  %s667_s12 = smov 0  }
   0x3 LB: > { %s682_s13 = sadd.s32 4294967295, %s641_s12   ;;  %s451_s14 = sadd.s32 4294967294, %s641_s12   ;;  %s641_s12 = sphi %s667_s12, %s839_s12   ;;  %s637_s11 = sphi %s665_s11, %s838_s11   ;;  %s633_s10 = sphi %s663_s10, %s837_s10   ;;  %s629_s9 = sphi %s661_s9, %s836_s9  }
   0x4   : > { %s686_s15 = sadd.s32 1, %s641_s12   ;;  %s69_s16 = sadd.s32 1, %s637_s11 }
   0x5   : > { %s66_s17 = ssub.s32 %s641_s12, %s686_s15  ;;  %p79_p0 = scmp.ne.s32.totalorder %s637_s11, %s633_s10 }
   0x6   : > { %p67_p1 = scmp.eq.s32.totalorder %s66_s17, 0  ;;  %p80_p2 = scmp.eq.s32.totalorder %s682_s13, 1 }
   0x7   : > { %p85_p3 = scmp.ne.s32.totalorder %s633_s10, %s629_s9  ;;  %p86_p4 = scmp.eq.s32.totalorder %s451_s14, 1 }
   0x8   : > { %s697_s18 = scalar_select %p67_p1, %s637_s11, %s69_s16  }
   0x9   : > { %p699_p5 = por %p80_p2, %p79_p0  ;;  %p703_p6 = por %p86_p4, %p85_p3 }
   0xa   : > { %p454_p7 = scmp.ge.s32.totalorder %s641_s12, 1  ;;  %p116_p8 = scmp.lt.s32.totalorder %s641_s12, 3 }
   0xc   : > { %p117_p9 = pnand %p454_p7, %p116_p8 }
   0xd   : > { %s456_s25 = sshll.u32 (!%p117_p9), %s682_s13, 4  ;;  %s135_s6 = sand.u32 (!%p117_p9), 1, %s633_s10  }
   0xe   : > { %120 = sbr.rel (%p117_p9) target bundleno = 250 (0xfa), region = 28  ;;  %p139_p10 = scmp.lt.s32.totalorder (!%p117_p9), %s456_s25, 31 }
   0xf   : > { %s455_s7 = sshll.u32 (!%p117_p9), %s135_s6, 7  ;;  %s479_s14 = sshll.u32 (!%p117_p9), %s682_s13, 11 }
  0x10   : > { %s762_s8 = scalar_lea.vmem (!%p117_p9), [#allocation2], %s455_s7  ;;  %s781_s22 = scalar_lea.hbm (!%p117_p9), %s833_s2, %s479_s14 }
  0x11   : > { %s389_s16 = sshll.u32 (!%p117_p9), %s762_s8, 4  ;;  %s791_s13 = scalar_lea.sflag (!%p117_p9), [#allocation3], %s135_s6  ;;  %s783_s16 = int_to_ptr.vmem [resolvable:$true] %s389_s16 }
  0x12   : > { %s581_s23 = scalar_lea.vmem (!%p117_p9), %s783_s16, 2048  ;;  %s643_s24 = smov (!%p117_p9), [#allocation2]  }
  0x13   : > { %v164_v0 = vld [vmem:[%s832_s1 + $0x18] sm:$0xff]  ;;  %v163_v1 = vld [vmem:[%s832_s1 + $0x10] sm:$0xff]  ;;  %v162_v2 = vld [vmem:[%s832_s1 + $0x8] sm:$0xff]  ;;  %s841_s25 = smov (!%p139_p10, %s456_s25), 31  ;;  %vm165_vm0 = vcmask 261120   ;;  %p582_p11 = scmp.ne.s32.totalorder %s783_s16, %s581_s23 }
  0x14   : > { %500 = vmatprep.subr.mxu0 %v164_v0  ;;  %532 = vmatprep.subr.mxu1 %v164_v0  ;;  %v161_v3 = vld [vmem:[%s832_s1] sm:$0xff]  ;;  %s457_s30 = sshll.u32 %s841_s25, 3  ;;  %s585_s25 = sshll.u32 %s643_s24, 4  ;;  %s586_s25 = int_to_ptr.vmem [resolvable:$false] %s585_s25 }
  0x15   : > { %501 = vmatpush3.msra.mxu0 %v164_v0  ;;  %536 = vmatpush3.msra.mxu1 %v164_v0  ;;  %s725_s5 = scalar_lea.vmem %s831_s0, %s457_s30  ;;  %p583_p12 = pnand %p582_p11, %p699_p5 }
  0x16   : > { %502 = vmatprep.subr.mxu0 %v163_v1  ;;  %533 = vmatprep.subr.mxu1 %v163_v1  ;;  %v145_v4 = vld [vmem:[%s725_s5] sm:$0xff]  ;;  %v146_v6 = vld [vmem:[%s725_s5 + $0x8] sm:$0xff]  ;;  %v147_v8 = vld [vmem:[%s725_s5 + $0x10] sm:$0xff]  ;;  %s587_s26 = scalar_lea.vmem %s586_s25, 4096  ;;  %p588_p0 = scmp.lt.s32.totalorder %s783_s16, %s586_s25 }
  0x17   : > { %503 = vmatpush3.msra.mxu0 %v163_v1  ;;  %537 = vmatpush3.msra.mxu1 %v163_v1  ;;  %v153_v5 = vld [vmem:[%s725_s5 + $0x40] sm:$0xff]  ;;  %v154_v7 = vld [vmem:[%s725_s5 + $0x48] sm:$0xff]  ;;  %v155_v9 = vld [vmem:[%s725_s5 + $0x50] sm:$0xff]  ;;  %p584_p13 = pneg %p583_p12  ;;  %p589_p1 = scmp.lt.s32.totalorder %s587_s26, %s581_s23 }
  0x18   : > { %504 = vmatprep.subr.mxu0 %v162_v2  ;;  %534 = vmatprep.subr.mxu1 %v162_v2  ;;  %v148_v10 = vld [vmem:[%s725_s5 + $0x18] sm:$0xff]  ;;  %v149_v12 = vld [vmem:[%s725_s5 + $0x20] sm:$0xff]  ;;  %v150_v14 = vld [vmem:[%s725_s5 + $0x28] sm:$0xff] }
  0x19   : > { %505 = vmatpush3.msra.mxu0 %v162_v2  ;;  %538 = vmatpush3.msra.mxu1 %v162_v2  ;;  %v156_v11 = vld [vmem:[%s725_s5 + $0x58] sm:$0xff]  ;;  %v157_v13 = vld [vmem:[%s725_s5 + $0x60] sm:$0xff]  ;;  %v158_v15 = vld [vmem:[%s725_s5 + $0x68] sm:$0xff]  ;;  %p590_p2 = por %p589_p1, %p588_p0 }
  0x1a   : > { %506 = vmatprep.subr.mxu0 %v161_v3  ;;  %535 = vmatprep.subr.mxu1 %v161_v3  ;;  %v151_v16 = vld [vmem:[%s725_s5 + $0x30] sm:$0xff]  ;;  %v152_v18 = vld [vmem:[%s725_s5 + $0x38] sm:$0xff] }
  0x1b   : > { %507 = vmatpush3.msra.mxu0 %v161_v3  ;;  %539 = vmatpush3.msra.mxu1 %v161_v3  ;;  %v159_v17 = vld [vmem:[%s725_s5 + $0x70] sm:$0xff]  ;;  %v160_v19 = vld [vmem:[%s725_s5 + $0x78] sm:$0xff]  ;;  %p591_p3 = pnand %p590_p2, %p584_p13 }
  0x1c   : > { %508 = vmatprep.mubr.msk.f32.mxu0 %vm165_vm0, %v145_v4  ;;  %520 = vmatprep.mubr.msk.f32.mxu1 %vm165_vm0, %v153_v5 }
  0x1d   : > { %509 = vmatmul.mubr.msk.f32.vlgmr.msra.gmra.mxu0 %vm165_vm0, %v146_v6  ;;  %521 = vmatmul.mubr.msk.f32.vlgmr.msra.gmra.mxu1 %vm165_vm0, %v154_v7 }
  0x1e   : > { %511 = vmatprep.mubr.msk.f32.mxu0 %vm165_vm0, %v147_v8  ;;  %523 = vmatprep.mubr.msk.f32.mxu1 %vm165_vm0, %v155_v9 }
  0x21   : > { %512 = vmatmul.mubr.msk.f32.gmra.mxu0 %vm165_vm0, %v148_v10  ;;  %524 = vmatmul.mubr.msk.f32.gmra.mxu1 %vm165_vm0, %v156_v11 }
  0x22   : > { %514 = vmatprep.mubr.msk.f32.mxu0 %vm165_vm0, %v149_v12  ;;  %526 = vmatprep.mubr.msk.f32.mxu1 %vm165_vm0, %v157_v13 }
  0x25   : > { %515 = vmatmul.mubr.msk.f32.gmra.mxu0 %vm165_vm0, %v150_v14  ;;  %527 = vmatmul.mubr.msk.f32.gmra.mxu1 %vm165_vm0, %v158_v15 }
  0x26   : > { %517 = vmatprep.mubr.msk.f32.mxu0 %vm165_vm0, %v151_v16  ;;  %529 = vmatprep.mubr.msk.f32.mxu1 %vm165_vm0, %v159_v17 }
  0x29   : > { %518 = vmatmul.mubr.msk.f32.gmra.mxu0 %vm165_vm0, %v152_v18  ;;  %530 = vmatmul.mubr.msk.f32.gmra.mxu1 %vm165_vm0, %v160_v19 }
  0xdd   : > { %v510_v20 = vpop.f32.mrf.mxu0  ;;  %v522_v21 = vpop.f32.mrf.mxu1 }
  0xde   : > { %360 = vst [vmem:[%s762_s8 + $0x8] sm:$0xff] %v510_v20  ;;  %368 = vst [vmem:[%s762_s8 + $0x48] sm:$0xff] %v522_v21 }
  0xdf   : > { %v280_v22 = vpop.f32.mrf.mxu0  ;;  %v320_v23 = vpop.f32.mrf.mxu1 }
  0xe0   : > { %359 = vst [vmem:[%s762_s8] sm:$0xff] %v280_v22  ;;  %367 = vst [vmem:[%s762_s8 + $0x40] sm:$0xff] %v320_v23 }
  0xe1   : > { %v513_v24 = vpop.f32.mrf.mxu0  ;;  %v525_v25 = vpop.f32.mrf.mxu1 }
  0xe2   : > { %362 = vst [vmem:[%s762_s8 + $0x18] sm:$0xff] %v513_v24  ;;  %370 = vst [vmem:[%s762_s8 + $0x58] sm:$0xff] %v525_v25 }
  0xe3   : > { %v290_v26 = vpop.f32.mrf.mxu0  ;;  %v330_v27 = vpop.f32.mrf.mxu1 }
  0xe4   : > { %361 = vst [vmem:[%s762_s8 + $0x10] sm:$0xff] %v290_v26  ;;  %369 = vst [vmem:[%s762_s8 + $0x50] sm:$0xff] %v330_v27 }
  0xe5   : > { %v516_v28 = vpop.f32.mrf.mxu0  ;;  %v528_v29 = vpop.f32.mrf.mxu1 }
  0xe6   : > { %364 = vst [vmem:[%s762_s8 + $0x28] sm:$0xff] %v516_v28  ;;  %372 = vst [vmem:[%s762_s8 + $0x68] sm:$0xff] %v528_v29 }
  0xe7   : > { %v300_v30 = vpop.f32.mrf.mxu0  ;;  %v340_v31 = vpop.f32.mrf.mxu1 }
  0xe8   : > { %363 = vst [vmem:[%s762_s8 + $0x20] sm:$0xff] %v300_v30  ;;  %371 = vst [vmem:[%s762_s8 + $0x60] sm:$0xff] %v340_v31 }
  0xe9   : > { %v519_v32 = vpop.f32.mrf.mxu0  ;;  %v531_v33 = vpop.f32.mrf.mxu1 }
  0xea   : > { %366 = vst [vmem:[%s762_s8 + $0x38] sm:$0xff] %v519_v32  ;;  %374 = vst [vmem:[%s762_s8 + $0x78] sm:$0xff] %v531_v33 }
  0xeb   : > { %v310_v34 = vpop.f32.mrf.mxu0  ;;  %v350_v35 = vpop.f32.mrf.mxu1 }
  0xec   : > { %365 = vst [vmem:[%s762_s8 + $0x30] sm:$0xff] %v310_v34  ;;  %373 = vst [vmem:[%s762_s8 + $0x70] sm:$0xff] %v350_v35 }
  0xed   : > { %594 = shalt.err (!%p591_p3)
}
  0xee   : > { %s595_s27 = scalar_lea.hbm %s781_s22, 2048  ;;  %s599_s30 = scalar_lea.hbm %s833_s2, 4096 }
  0xef   : > { %p596_p4 = scmp.ne.s32.totalorder %s781_s22, %s595_s27  ;;  %p600_p9 = scmp.lt.s32.totalorder %s781_s22, %s833_s2 }
  0xf0   : > { %p601_p10 = scmp.lt.s32.totalorder %s599_s30, %s595_s27 }
  0xf1   : > { %p597_p7 = pnand %p596_p4, %p699_p5 }
  0xf2   : > { %p602_p11 = por %p601_p10, %p600_p9 }
  0xf3   : > { %p598_p8 = pneg %p597_p7 }
  0xf5   : > { %p603_p12 = pnand %p602_p11, %p598_p8 }
  0xf7   : > { %606 = shalt.err (!%p603_p12)
}
  0xf8   : > { %s644_s5 = smov 128   ;;  %s645_s6 = smov 8  }
  0xf9   : > { %540 = dma.vmem_to_hbm [thread:$0]  (%p699_p5), %s783_s16, 2048, %s781_s22, %s791_s13, %s644_s5, %s644_s5, %s645_s6  }
  0xfa PF: > { %p546_p13 = scmp.ge.s32.totalorder %s641_s12, 2  ;;  %s404_s7 = sand.u32 1, %s629_s9  }
  0xfb   : > { %s405_s8 = scalar_lea.sflag [#allocation3], %s404_s7 }
  0xfc   : > { %p543_p0 = pnand %p546_p13, %p703_p6 }
  0xfe   : > { %p544_p1 = pneg %p543_p0 }
 0x100   : > { %624 = dma.done.wait (%p544_p1), %s405_s8, 2048  }
 0x101   : > { %626 = vsyncadd (%p544_p1), %s405_s8, 4294965248  ;;  %p12_p2 = scmp.ge.s32.totalorder %s686_s15, 4   ;;  %s836_s9 = smov %s633_s10 }
 0x102   : > { %s837_s10 = smov %s637_s11  ;;  %s838_s11 = smov %s697_s18 }
 0x103   : > { %s839_s12 = smov %s686_s15  ;;  %14 = sbr.rel (!%p12_p2) target bundleno = 3 (0x3), region = 63 }
 0x108   :  { %410 = vsyncpa [#allocation3], 1 }
 0x109   :  { %412 = vsyncpa [#allocation3 + $0x1], 1 }

</bundles_post_ra>
